<compile_context>
chip_gen: v7x
topology: tpu7x:2x2x1
jax: 0.10.0
libtpu: 0.0.40
codegen_flags: <defaults>
</compile_context>

<pallas_src>
import functools

import jax
import jax.numpy as jnp
from jax import lax
from jax.experimental import pallas as pl
from jax.experimental.pallas import tpu as pltpu


def _pointwise_tn_kernel(x_ref, w_ref, o_ref, *, bk, nsub):
    """One grid step = `nsub` sub-blocks of `bk` batch rows of one group.

    x_ref: (bb, CT, HWp)       input slab (also the residual), bb = nsub*bk
    w_ref: (L, bk*CT, bk*CT)   per-layer block-diagonal kron(I_{bk*C}, W_g)
    o_ref: (bb, CT, HWp)       output slab (same layout)
    """
    _, CT, HW = x_ref.shape
    L = w_ref.shape[0]
    bkct = bk * CT

    def body(s, carry):
        row = pl.multiple_of(s * bk, bk)
        # Free leading-dim merge: (bk, CT, HW) -> (bk*CT, HW), CT % 8 == 0.
        x0 = x_ref[pl.ds(row, bk)].reshape(bkct, HW)
        h = x0
        for l in range(L):                       # L is tiny (len(channels))
            h = jnp.dot(w_ref[l], h.astype(w_ref.dtype),
                        preferred_element_type=jnp.float32)
            h = jnp.maximum(h, 0.0)              # ReLU (Dropout == identity, eval)
        y = jnp.maximum(h + x0.astype(jnp.float32), 0.0)   # residual + final ReLU
        o_ref[pl.ds(row, bk)] = y.reshape(bk, CT, HW).astype(o_ref.dtype)
        return carry

    lax.fori_loop(0, nsub, body, 0, unroll=nsub <= 4)


def _mxu_contract_target():
    """Kron-fold row target ~= MXU contraction width: 128 on v5e, 256 newer."""
    try:
        kind = jax.devices()[0].device_kind.lower()
        if "v5 lite" in kind or "v5e" in kind or "v5lite" in kind:
            return 128
    except Exception:  # pragma: no cover - be robust to odd device strings
        pass
    return 256


def pointwise_tn_forward(x, weights, num_output, *, use_bf16=False,
                         block_byte_cap=8 << 20, vmem_limit_bytes=48 << 20):
    """x: (B, FC, T, H, W) float32, FC = num_output * C (group-major fc = g*C + c).
    weights: (L, num_output, T, T) — grouped Conv1d(kernel=1) weights per layer.
    """
    B, FC, T, H, W = x.shape
    G = num_output
    assert FC % G == 0
    C = FC // G
    HW = H * W
    CT = C * T
    L, Gw, Ti, Tj = weights.shape
    assert Gw == G and Ti == T and Tj == T

    # Free contiguous reshape: (B, G*C, T, H, W) -> (B, G, C*T, H*W).
    x2 = x.reshape(B, G, CT, HW)

    # Lane-density guard: pad HW up to a multiple of 128 (zeros stay zeros
    # through matmul/ReLU/residual and are sliced off afterwards).
    HWp = -(-HW // 128) * 128
    if HWp != HW:
        x2 = jnp.pad(x2, ((0, 0), (0, 0), (0, 0), (0, HWp - HW)))

    # Kron batch fold: bk rows folded into one block-diagonal matmul.
    mxu = _mxu_contract_target()
    bk = max(1, min(B, mxu // CT)) if CT % 8 == 0 else 1
    bkct = bk * CT

    # Batch block size bb (multiple of bk), capped by block_byte_cap.
    itemsize = 2 if use_bf16 else x.dtype.itemsize
    row_bytes = CT * HWp * itemsize
    bb = max(bk, (block_byte_cap // (row_bytes * bk)) * bk)
    bb = min(bb, -(-B // bk) * bk)               # never exceed (padded) batch
    if G == 1 and B > bk:
        # Keep >= 2 batch steps so both v7x TensorCores get work.
        half_rows = max(bk, -(-(B // 2) // bk) * bk)
        bb = min(bb, half_rows)
    nsub = bb // bk

    Bp = -(-B // bb) * bb                        # pad batch to a multiple of bb
    if Bp != B:
        x2 = jnp.pad(x2, ((0, Bp - B), (0, 0), (0, 0), (0, 0)))
    nb = Bp // bb

    # Block-diagonal weights: big_w[l, g] = kron(I_{bk*C}, weights[l, g]).
    eye = jnp.eye(bk * C, dtype=weights.dtype)
    big_w = jnp.einsum("mn,lgij->lgminj", eye, weights).reshape(L, G, bkct, bkct)

    in_dtype = jnp.bfloat16 if use_bf16 else x.dtype
    x2 = x2.astype(in_dtype)
    big_w = big_w.astype(in_dtype)

    kernel = functools.partial(_pointwise_tn_kernel, bk=bk, nsub=nsub)

    out2 = pl.pallas_call(
        kernel,
        out_shape=jax.ShapeDtypeStruct((Bp, G, CT, HWp), x.dtype),
        grid_spec=pltpu.PrefetchScalarGridSpec(
            num_scalar_prefetch=0,
            grid=(G, nb),
            in_specs=[
                # x: bb batch rows of one group (group dim squeezed out).
                pl.BlockSpec((bb, None, CT, HWp), lambda g, b: (b, g, 0, 0)),
                # weights: constant along the inner batch axis -> VMEM resident.
                pl.BlockSpec((L, None, bkct, bkct), lambda g, b: (0, g, 0, 0)),
            ],
            out_specs=pl.BlockSpec((bb, None, CT, HWp), lambda g, b: (b, g, 0, 0)),
        ),
        compiler_params=pltpu.CompilerParams(
            dimension_semantics=("parallel", "parallel"),
            vmem_limit_bytes=vmem_limit_bytes,
        ),
    )(x2, big_w)

    # Drop padding; free contiguous reshape back to the original layout.
    out2 = out2[:B, :, :, :HW]
    return out2.reshape(B, FC, T, H, W)


def _reference_forward(x, weights, num_output):
    """Pure-JAX reference mirroring the PyTorch forward (eval mode)."""
    B, FC, T, H, W = x.shape
    G = num_output
    C = FC // G
    residual = x
    h = x.reshape(B, G, C, T, H * W)
    for l in range(weights.shape[0]):
        h = jnp.einsum("gij,bgcjp->bgcip", weights[l], h)
        h = jnp.maximum(h, 0.0)
    h = h.reshape(B, FC, T, H, W)
    return jnp.maximum(h + residual, 0.0)


if __name__ == "__main__":
    # Module config: channels = [T, T] (two inner Conv1d layers), num_output = 2.
    num_output = 2
    C = 4                  # feature channels per output group
    T = 8                  # temporal length (== Conv1d channel count per group)
    H = W = 16
    B = 2
    FC = num_output * C
    num_layers = 2         # len(channels)

    key = jax.random.PRNGKey(0)
    kx, kw = jax.random.split(key)
    x = jax.random.normal(kx, (B, FC, T, H, W), dtype=jnp.float32)
    # Deterministic synthetic weights, Kaiming-ish scale for a 1x1 grouped conv.
    weights = jax.random.normal(
        kw, (num_layers, num_output, T, T), dtype=jnp.float32
    ) * (1.0 / jnp.sqrt(T).astype(jnp.float32))

    ref = _reference_forward(x, weights, num_output)

    # f32 path (exact parity with the reference).
    fwd = jax.jit(functools.partial(pointwise_tn_forward, num_output=num_output))
    out = jax.block_until_ready(fwd(x, weights))
    assert out.shape == (B, FC, T, H, W)
    assert jnp.allclose(out, ref, atol=1e-5, rtol=1e-5)

    # bf16-HBM path (halves bytes moved; f32 accumulate) — loose tolerance.
    fwd_bf16 = jax.jit(functools.partial(
        pointwise_tn_forward, num_output=num_output, use_bf16=True))
    out_bf16 = jax.block_until_ready(fwd_bf16(x, weights))
    assert out_bf16.shape == (B, FC, T, H, W)
    assert jnp.allclose(out_bf16, ref, atol=1e-1, rtol=1e-1)

    print("KERNEL_OK")
</pallas_src>

<mosaic_0001>
module attributes {stable_mosaic.version = 11 : i64} {
  func.func @_pointwise_tn_kernel(%arg0: i32, %arg1: i32, %arg2: memref<2x1x32x256xf32, #tpu.memory_space<vmem>>, %arg3: memref<2x1x64x64xf32, #tpu.memory_space<vmem>>, %arg4: memref<2x1x32x256xf32, #tpu.memory_space<vmem>>) attributes {dimension_semantics = [#tpu.dimension_semantics<parallel>, #tpu.dimension_semantics<parallel>], iteration_bounds = array<i64: 2, 1>, scalar_prefetch = 0 : i64, scratch_operands = 0 : i64, tpu.core_type = #tpu.core_type<tc>, window_params = [{transform_indices = @transform_0, window_bounds = array<i64: 2, 1, 32, 256>}, {transform_indices = @transform_1, window_bounds = array<i64: 2, 1, 64, 64>}, {transform_indices = @transform_2, window_bounds = array<i64: 2, 1, 32, 256>}]} {
    %c0_i32 = arith.constant 0 : i32
    %c2_i32 = arith.constant 2 : i32
    %0 = arith.muli %c0_i32, %c2_i32 : i32
    %1 = tpu.assume_multiple %0, 2 : i32
    %2 = arith.index_cast %1 : i32 to index
    %c0 = arith.constant 0 : index
    %c0_0 = arith.constant 0 : index
    %c0_1 = arith.constant 0 : index
    %3 = vector.load %arg2[%2, %c0, %c0_0, %c0_1] : memref<2x1x32x256xf32, #tpu.memory_space<vmem>>, vector<2x1x32x256xf32>
    %4 = vector.shape_cast %3 : vector<2x1x32x256xf32> to vector<2x32x256xf32>
    %5 = vector.shape_cast %4 : vector<2x32x256xf32> to vector<64x256xf32>
    %c0_2 = arith.constant 0 : index
    %c0_3 = arith.constant 0 : index
    %c0_4 = arith.constant 0 : index
    %c0_5 = arith.constant 0 : index
    %6 = vector.load %arg3[%c0_2, %c0_3, %c0_4, %c0_5] : memref<2x1x64x64xf32, #tpu.memory_space<vmem>>, vector<1x1x64x64xf32>
    %7 = vector.shape_cast %6 : vector<1x1x64x64xf32> to vector<64x64xf32>
    %cst = arith.constant dense<0.000000e+00> : vector<64x256xf32>
    %8 = tpu.matmul %7, %5, %cst {dimension_numbers = #tpu.dot_dimension_numbers<[1], [0], [0], [1], [0, 0, 1, 1], [], []>} : vector<64x64xf32>, vector<64x256xf32>, vector<64x256xf32> -> vector<64x256xf32>
    %cst_6 = arith.constant 0.000000e+00 : f32
    %9 = vector.broadcast %cst_6 : f32 to vector<64x256xf32>
    %10 = arith.maximumf %8, %9 : vector<64x256xf32>
    %c1 = arith.constant 1 : index
    %c0_7 = arith.constant 0 : index
    %c0_8 = arith.constant 0 : index
    %c0_9 = arith.constant 0 : index
    %11 = vector.load %arg3[%c1, %c0_7, %c0_8, %c0_9] : memref<2x1x64x64xf32, #tpu.memory_space<vmem>>, vector<1x1x64x64xf32>
    %12 = vector.shape_cast %11 : vector<1x1x64x64xf32> to vector<64x64xf32>
    %cst_10 = arith.constant dense<0.000000e+00> : vector<64x256xf32>
    %13 = tpu.matmul %12, %10, %cst_10 {dimension_numbers = #tpu.dot_dimension_numbers<[1], [0], [0], [1], [0, 0, 1, 1], [], []>} : vector<64x64xf32>, vector<64x256xf32>, vector<64x256xf32> -> vector<64x256xf32>
    %cst_11 = arith.constant 0.000000e+00 : f32
    %14 = vector.broadcast %cst_11 : f32 to vector<64x256xf32>
    %15 = arith.maximumf %13, %14 : vector<64x256xf32>
    %16 = arith.addf %15, %5 : vector<64x256xf32>
    %cst_12 = arith.constant 0.000000e+00 : f32
    %17 = vector.broadcast %cst_12 : f32 to vector<64x256xf32>
    %18 = arith.maximumf %16, %17 : vector<64x256xf32>
    %19 = vector.shape_cast %18 : vector<64x256xf32> to vector<2x32x256xf32>
    %20 = arith.index_cast %1 : i32 to index
    %c0_13 = arith.constant 0 : index
    %c0_14 = arith.constant 0 : index
    %c0_15 = arith.constant 0 : index
    %21 = vector.load %arg4[%20, %c0_13, %c0_14, %c0_15] : memref<2x1x32x256xf32, #tpu.memory_space<vmem>>, vector<2x1x32x256xf32>
    %22 = vector.shape_cast %21 : vector<2x1x32x256xf32> to vector<2x32x256xf32>
    %23 = vector.shape_cast %19 : vector<2x32x256xf32> to vector<2x1x32x256xf32>
    tpu.vector_store %arg4[%20, %c0_13, %c0_14, %c0_15], %23 {strides = array<i32>} : memref<2x1x32x256xf32, #tpu.memory_space<vmem>>, vector<2x1x32x256xf32>,
    %c1_i32 = arith.constant 1 : i32
    return
  }
  func.func @transform_0(%arg0: i32, %arg1: i32) -> (i32, i32, i32, i32) {
    %c0_i32 = arith.constant 0 : i32
    %c0_i32_0 = arith.constant 0 : i32
    %c0_i32_1 = arith.constant 0 : i32
    return %arg1, %arg0, %c0_i32, %c0_i32_0 : i32, i32, i32, i32
  }
  func.func @transform_1(%arg0: i32, %arg1: i32) -> (i32, i32, i32, i32) {
    %c0_i32 = arith.constant 0 : i32
    %c0_i32_0 = arith.constant 0 : i32
    %c0_i32_1 = arith.constant 0 : i32
    %c0_i32_2 = arith.constant 0 : i32
    return %c0_i32, %arg0, %c0_i32_0, %c0_i32_1 : i32, i32, i32, i32
  }
  func.func @transform_2(%arg0: i32, %arg1: i32) -> (i32, i32, i32, i32) {
    %c0_i32 = arith.constant 0 : i32
    %c0_i32_0 = arith.constant 0 : i32
    %c0_i32_1 = arith.constant 0 : i32
    return %arg1, %arg0, %c0_i32, %c0_i32_0 : i32, i32, i32, i32
  }
}

</mosaic_0001>

<bundles_post_ra>
// kernel: pointwise_tn_forward.1
= control target key start
LH: loop header
LB: loop body
LE: loop exit
PB: predicated region body
PF: predicated region fallthrough
CT: control target
= control target key end

     0   :  { %s1041_s9 = smov 0   ;;  %s1043_s10 = smov 0   ;;  %s1315_s0 = inlined_call_operand.vmem [shape: f32[2,2,32,256], index: 0, kind: input, shape index: {}]   ;;  %s1316_s1 = inlined_call_operand.vmem [shape: f32[2,2,64,64], index: 1, kind: input, shape index: {}]   ;;  %s1317_s2 = inlined_call_operand.vmem [shape: f32[2,2,32,256], index: 2, kind: output, shape index: {}]  }
   0x1   :  { %s1045_s11 = smov 0   ;;  %s1047_s12 = smov 0  }
   0x2   :  { %s1049_s13 = smov 0  }
   0x3 LB: > { %s24_s14 = sadd.s32 1, %s1019_s12  ;;  %s866_s15 = sadd.s32 4294967295, %s1023_s13   ;;  %s1023_s13 = sphi %s1049_s13, %s12_s13   ;;  %s1019_s12 = sphi %s1047_s12, %s1323_s12   ;;  %s1015_s11 = sphi %s1045_s11, %s1322_s11   ;;  %s1011_s10 = sphi %s1043_s10, %s1321_s10   ;;  %s1007_s9 = sphi %s1041_s9, %s1320_s9  }
   0x4   : > { %p26_p0 = scmp.ge.s32.totalorder %s24_s14, 2  ;;  %p40_p1 = scmp.ne.s32.totalorder %s1011_s10, %s1007_s9 }
   0x5   : > { %p41_p2 = scmp.eq.s32.totalorder %s1023_s13, 0  ;;  %p98_p4 = scmp.eq.s32.totalorder %s866_s15, 1 }
   0x6   : > { %s1325_s14 = smov (%p26_p0, %s24_s14), 0  ;;  %s33_s18 = sadd.s32 1, %s1011_s10 }
   0x7   : > { %p1073_p3 = por %p41_p2, %p40_p1  ;;  %s29_s17 = ssub.s32 %s1019_s12, %s1325_s14 }
   0x8   : > { %p31_p5 = scmp.eq.s32.totalorder %s29_s17, 0  ;;  %p1080_p6 = por %p98_p4, %p40_p1 }
   0x9   : > { %p869_p7 = scmp.ge.s32.totalorder %s1023_s13, 2 }
   0xa   : > { %s1085_s20 = scalar_select %p31_p5, %s1011_s10, %s33_s18  }
   0xb   : > { %120 = sbr.rel (%p869_p7) target bundleno = 42 (0x2a), region = 16 }
  0x12   : > { %123 = sbr.rel (!%p1073_p3) target bundleno = 30 (0x1e), region = 20  ;;  %s125_s21 = sand.u32 (%p1073_p3), 1, %s1011_s10  }
  0x13   : > { %s909_s22 = sshll.u32 (%p1073_p3), %s1019_s12, 6  ;;  %s870_s23 = sshll.u32 (%p1073_p3), %s125_s21, 7 }
  0x14   : > { %s1095_s26 = scalar_lea.vmem (%p1073_p3), %s1315_s0, %s909_s22  ;;  %s127_s27 = scalar_lea.vmem (%p1073_p3), [#allocation2], %s870_s23 }
  0x15   : > { %v146_v0 = vld [vmem:[%s1095_s26] sm:$0xff] (%p1073_p3)  ;;  %v148_v1 = vld [vmem:[%s1095_s26 + $0x8] sm:$0xff] (%p1073_p3)  ;;  %v150_v2 = vld [vmem:[%s1095_s26 + $0x10] sm:$0xff] (%p1073_p3) }
  0x16   : > { %147 = vst [vmem:[%s127_s27] sm:$0xff] (%p1073_p3), %v146_v0  ;;  %149 = vst [vmem:[%s127_s27 + $0x8] sm:$0xff] (%p1073_p3), %v148_v1  ;;  %v152_v3 = vld [vmem:[%s1095_s26 + $0x18] sm:$0xff] (%p1073_p3)  ;;  %v154_v4 = vld [vmem:[%s1095_s26 + $0x20] sm:$0xff] (%p1073_p3) }
  0x17   : > { %151 = vst [vmem:[%s127_s27 + $0x10] sm:$0xff] (%p1073_p3), %v150_v2  ;;  %v156_v5 = vld [vmem:[%s1095_s26 + $0x28] sm:$0xff] (%p1073_p3)  ;;  %153 = vst [vmem:[%s127_s27 + $0x18] sm:$0xff] (%p1073_p3), %v152_v3  ;;  %v158_v6 = vld [vmem:[%s1095_s26 + $0x30] sm:$0xff] (%p1073_p3) }
  0x18   : > { %155 = vst [vmem:[%s127_s27 + $0x20] sm:$0xff] (%p1073_p3), %v154_v4  ;;  %157 = vst [vmem:[%s127_s27 + $0x28] sm:$0xff] (%p1073_p3), %v156_v5  ;;  %v160_v7 = vld [vmem:[%s1095_s26 + $0x38] sm:$0xff] (%p1073_p3)  ;;  %v162_v8 = vld [vmem:[%s1095_s26 + $0x80] sm:$0xff] (%p1073_p3) }
  0x19   : > { %159 = vst [vmem:[%s127_s27 + $0x30] sm:$0xff] %v158_v6  ;;  %161 = vst [vmem:[%s127_s27 + $0x38] sm:$0xff] %v160_v7  ;;  %v164_v9 = vld [vmem:[%s1095_s26 + $0x88] sm:$0xff]  ;;  %v166_v10 = vld [vmem:[%s1095_s26 + $0x90] sm:$0xff] }
  0x1a   : > { %163 = vst [vmem:[%s127_s27 + $0x40] sm:$0xff] %v162_v8  ;;  %v168_v11 = vld [vmem:[%s1095_s26 + $0x98] sm:$0xff]  ;;  %165 = vst [vmem:[%s127_s27 + $0x48] sm:$0xff] %v164_v9  ;;  %v170_v12 = vld [vmem:[%s1095_s26 + $0xa0] sm:$0xff] }
  0x1b   : > { %167 = vst [vmem:[%s127_s27 + $0x50] sm:$0xff] %v166_v10  ;;  %169 = vst [vmem:[%s127_s27 + $0x58] sm:$0xff] %v168_v11  ;;  %v172_v13 = vld [vmem:[%s1095_s26 + $0xa8] sm:$0xff]  ;;  %v174_v14 = vld [vmem:[%s1095_s26 + $0xb0] sm:$0xff] }
  0x1c   : > { %171 = vst [vmem:[%s127_s27 + $0x60] sm:$0xff] %v170_v12  ;;  %173 = vst [vmem:[%s127_s27 + $0x68] sm:$0xff] %v172_v13  ;;  %v176_v15 = vld [vmem:[%s1095_s26 + $0xb8] sm:$0xff] }
  0x1d   : > { %175 = vst [vmem:[%s127_s27 + $0x70] sm:$0xff] %v174_v14  ;;  %177 = vst [vmem:[%s127_s27 + $0x78] sm:$0xff] %v176_v15 }
  0x1e PF: > { %183 = sbr.rel (!%p1073_p3) target bundleno = 42 (0x2a), region = 43  ;;  %s185_s28 = sand.u32 (%p1073_p3), 1, %s1011_s10  }
  0x1f   : > { %s910_s29 = sshll.u32 (%p1073_p3), %s1019_s12, 6  ;;  %s873_s30 = sshll.u32 (%p1073_p3), %s185_s28, 7 }
  0x20   : > { %s1120_s5 = scalar_lea.vmem (%p1073_p3), %s1316_s1, %s910_s29  ;;  %s187_s6 = scalar_lea.vmem (%p1073_p3), [#allocation3], %s873_s30 }
  0x21   : > { %v248_v16 = vld [vmem:[%s1120_s5] sm:$0xff] (%p1073_p3)  ;;  %v250_v17 = vld [vmem:[%s1120_s5 + $0x8] sm:$0xff] (%p1073_p3)  ;;  %v252_v18 = vld [vmem:[%s1120_s5 + $0x10] sm:$0xff] (%p1073_p3) }
  0x22   : > { %249 = vst [vmem:[%s187_s6] sm:$0xff] (%p1073_p3), %v248_v16  ;;  %251 = vst [vmem:[%s187_s6 + $0x8] sm:$0xff] (%p1073_p3), %v250_v17  ;;  %v254_v19 = vld [vmem:[%s1120_s5 + $0x18] sm:$0xff] (%p1073_p3)  ;;  %v256_v20 = vld [vmem:[%s1120_s5 + $0x20] sm:$0xff] (%p1073_p3) }
  0x23   : > { %253 = vst [vmem:[%s187_s6 + $0x10] sm:$0xff] (%p1073_p3), %v252_v18  ;;  %v258_v21 = vld [vmem:[%s1120_s5 + $0x28] sm:$0xff] (%p1073_p3)  ;;  %255 = vst [vmem:[%s187_s6 + $0x18] sm:$0xff] (%p1073_p3), %v254_v19  ;;  %v260_v22 = vld [vmem:[%s1120_s5 + $0x30] sm:$0xff] (%p1073_p3) }
  0x24   : > { %257 = vst [vmem:[%s187_s6 + $0x20] sm:$0xff] (%p1073_p3), %v256_v20  ;;  %259 = vst [vmem:[%s187_s6 + $0x28] sm:$0xff] (%p1073_p3), %v258_v21  ;;  %v262_v23 = vld [vmem:[%s1120_s5 + $0x38] sm:$0xff] (%p1073_p3)  ;;  %v264_v24 = vld [vmem:[%s1120_s5 + $0x80] sm:$0xff] (%p1073_p3) }
  0x25   : > { %261 = vst [vmem:[%s187_s6 + $0x30] sm:$0xff] %v260_v22  ;;  %263 = vst [vmem:[%s187_s6 + $0x38] sm:$0xff] %v262_v23  ;;  %v266_v25 = vld [vmem:[%s1120_s5 + $0x88] sm:$0xff]  ;;  %v268_v26 = vld [vmem:[%s1120_s5 + $0x90] sm:$0xff] }
  0x26   : > { %265 = vst [vmem:[%s187_s6 + $0x40] sm:$0xff] %v264_v24  ;;  %v270_v27 = vld [vmem:[%s1120_s5 + $0x98] sm:$0xff]  ;;  %267 = vst [vmem:[%s187_s6 + $0x48] sm:$0xff] %v266_v25  ;;  %v272_v28 = vld [vmem:[%s1120_s5 + $0xa0] sm:$0xff] }
  0x27   : > { %269 = vst [vmem:[%s187_s6 + $0x50] sm:$0xff] %v268_v26  ;;  %271 = vst [vmem:[%s187_s6 + $0x58] sm:$0xff] %v270_v27  ;;  %v274_v29 = vld [vmem:[%s1120_s5 + $0xa8] sm:$0xff]  ;;  %v276_v30 = vld [vmem:[%s1120_s5 + $0xb0] sm:$0xff] }
  0x28   : > { %273 = vst [vmem:[%s187_s6 + $0x60] sm:$0xff] %v272_v28  ;;  %275 = vst [vmem:[%s187_s6 + $0x68] sm:$0xff] %v274_v29  ;;  %v278_v31 = vld [vmem:[%s1120_s5 + $0xb8] sm:$0xff] }
  0x29   : > { %277 = vst [vmem:[%s187_s6 + $0x70] sm:$0xff] %v276_v30  ;;  %279 = vst [vmem:[%s187_s6 + $0x78] sm:$0xff] %v278_v31 }
  0x2a PF: > { %p876_p8 = scmp.ge.s32.totalorder %s1023_s13, 1  ;;  %p284_p9 = scmp.lt.s32.totalorder %s1023_s13, 3 }
  0x2c   : > { %p285_p10 = pnand %p876_p8, %p284_p9 }
  0x2d   : > { %s291_s7 = sand.u32 (!%p285_p10), 1, %s1007_s9   ;;  %v1025_v32 = vmov (!%p285_p10), 0.0   ;;  %vm351_vm0 = vcmask (!%p285_p10), 523264  }
  0x2e   : > { %288 = sbr.rel (%p285_p10) target bundleno = 572 (0x23c), region = 81  ;;  %s1141_s8 = sshll.u32 (!%p285_p10), %s291_s7, 7  ;;  %440 = vmatprep.mubr.f32.mxu0 (!%p285_p10), %v1025_v32  ;;  %602 = vmatprep.mubr.f32.mxu1 (!%p285_p10), %v1025_v32 }
  0x2f   : > { %s293_s15 = scalar_lea.vmem (!%p285_p10), [#allocation2], %s1141_s8  ;;  %s1195_s9 = scalar_lea.vmem (!%p285_p10), [#allocation3], %s1141_s8 }
  0x30   : > { %v1146_v33 = vld [vmem:[%s293_s15 + $0x8] sm:$0xff] (!%p285_p10)  ;;  %v1148_v34 = vld [vmem:[%s293_s15 + $0x18] sm:$0xff] (!%p285_p10)  ;;  %v1150_v35 = vld [vmem:[%s293_s15] sm:$0xff] (!%p285_p10)  ;;  %s1246_s16 = scalar_lea.vmem (!%p285_p10), [#allocation4], %s1141_s8 }
  0x31   : > { %v912_v36 = vpack.c.bf16 (!%p285_p10), %v1148_v34, %v1146_v33  ;;  %v1154_v37 = vld [vmem:[%s293_s15 + $0x10] sm:$0xff] (!%p285_p10)  ;;  %v1156_v38 = vld [vmem:[%s293_s15 + $0x28] sm:$0xff] (!%p285_p10)  ;;  %v1158_v39 = vld [vmem:[%s293_s15 + $0x38] sm:$0xff] (!%p285_p10) }
  0x32   : > { %v914_v40 = vpack.c.bf16 (!%p285_p10), %v1154_v37, %v1150_v35  ;;  %v916_v41 = vpack.c.bf16 (!%p285_p10), %v1158_v39, %v1156_v38  ;;  %v1164_v42 = vld [vmem:[%s293_s15 + $0x20] sm:$0xff] (!%p285_p10)  ;;  %v1166_v43 = vld [vmem:[%s293_s15 + $0x30] sm:$0xff] (!%p285_p10)  ;;  %v1168_v44 = vld [vmem:[%s293_s15 + $0x48] sm:$0xff] (!%p285_p10) }
  0x33   : > { %913 = vmatprep.subr.bf16.mxu0 (!%p285_p10), %v912_v36  ;;  %v1170_v45 = vld [vmem:[%s293_s15 + $0x58] sm:$0xff] (!%p285_p10)  ;;  %v918_v46 = vpack.c.bf16 (!%p285_p10), %v1166_v43, %v1164_v42  ;;  %v1176_v48 = vld [vmem:[%s293_s15 + $0x40] sm:$0xff] (!%p285_p10)  ;;  %v1178_v49 = vld [vmem:[%s293_s15 + $0x50] sm:$0xff] (!%p285_p10) }
  0x34   : > { %915 = vmatpush1.bf16.msra.mxu0 (!%p285_p10), %v914_v40  ;;  %v920_v47 = vpack.c.bf16 (!%p285_p10), %v1170_v45, %v1168_v44  ;;  %v1180_v50 = vld [vmem:[%s293_s15 + $0x68] sm:$0xff] (!%p285_p10)  ;;  %v1182_v51 = vld [vmem:[%s293_s15 + $0x78] sm:$0xff] (!%p285_p10)  ;;  %v922_v52 = vpack.c.bf16 (!%p285_p10), %v1178_v49, %v1176_v48  ;;  %v1188_v54 = vld [vmem:[%s293_s15 + $0x60] sm:$0xff] (!%p285_p10) }
  0x35   : > { %917 = vmatprep.subr.bf16.mxu0 %v916_v41  ;;  %v924_v53 = vpack.c.bf16 %v1182_v51, %v1180_v50  ;;  %v1190_v55 = vld [vmem:[%s293_s15 + $0x70] sm:$0xff]  ;;  %v343_v57 = vld [vmem:[%s1195_s9] sm:$0xff]  ;;  %v344_v58 = vld [vmem:[%s1195_s9 + $0x8] sm:$0xff]  ;;  %s911_s17 = sshll.u32 (%p1080_p6), %s1015_s11, 6 }
  0x36   : > { %v926_v56 = vpack.c.bf16 %v1190_v55, %v1188_v54  ;;  %v345_v59 = vld [vmem:[%s1195_s9 + $0x10] sm:$0xff]  ;;  %v346_v60 = vld [vmem:[%s1195_s9 + $0x18] sm:$0xff]  ;;  %v347_v61 = vld [vmem:[%s1195_s9 + $0x20] sm:$0xff]  ;;  %s729_s22 = scalar_lea.vmem (%p1080_p6), %s1317_s2, %s911_s17 }
  0x37   : > { %v348_v62 = vld [vmem:[%s1195_s9 + $0x28] sm:$0xff]  ;;  %v349_v63 = vld [vmem:[%s1195_s9 + $0x30] sm:$0xff]  ;;  %v350_v0 = vld [vmem:[%s1195_s9 + $0x38] sm:$0xff] }
  0x38   : > { %919 = vmatpush1.bf16.msra.mxu0 %v918_v46 }
  0x39   : > { %921 = vmatprep.subr.bf16.mxu0 %v920_v47 }
  0x3c   : > { %923 = vmatpush1.bf16.msra.mxu0 %v922_v52 }
  0x3d   : > { %925 = vmatprep.subr.bf16.mxu0 %v924_v53 }
  0x40   : > { %927 = vmatpush1.bf16.msra.mxu0 %v926_v56 }
  0x43   : > { %880 = vmatmul.mubr.msk.f32.vlgmr.msra.gmra.mrb[0].mxu0 %vm351_vm0, %v343_v57 }
  0x44   : > { %446 = vmatprep.mubr.f32.mxu0 %v1025_v32 }
  0x47   : > { %881 = vmatmul.mubr.msk.f32.gmra.mrb[2].mxu0 %vm351_vm0, %v344_v58  ;;  %v888_v58 = vld [vmem:[%s1195_s9 + $0x40] sm:$0xff] }
  0x48   : > { %452 = vmatprep.mubr.f32.mxu0 %v1025_v32 }
  0x4b   : > { %882 = vmatmul.mubr.msk.f32.gmra.mrb[4].mxu0 %vm351_vm0, %v345_v59  ;;  %v889_v59 = vld [vmem:[%s1195_s9 + $0x48] sm:$0xff] }
  0x4c   : > { %458 = vmatprep.mubr.f32.mxu0 %v1025_v32 }
  0x4f   : > { %883 = vmatmul.mubr.msk.f32.gmra.mrb[6].mxu0 %vm351_vm0, %v346_v60  ;;  %v890_v60 = vld [vmem:[%s1195_s9 + $0x50] sm:$0xff] }
  0x50   : > { %464 = vmatprep.mubr.f32.mxu0 %v1025_v32 }
  0x53   : > { %884 = vmatmul.mubr.msk.f32.gmra.mrb[8].mxu0 %vm351_vm0, %v347_v61  ;;  %v891_v61 = vld [vmem:[%s1195_s9 + $0x58] sm:$0xff] }
  0x54   : > { %470 = vmatprep.mubr.f32.mxu0 %v1025_v32 }
  0x57   : > { %885 = vmatmul.mubr.msk.f32.gmra.mrb[10].mxu0 %vm351_vm0, %v348_v62  ;;  %v892_v62 = vld [vmem:[%s1195_s9 + $0x60] sm:$0xff] }
  0x58   : > { %476 = vmatprep.mubr.f32.mxu0 %v1025_v32 }
  0x5b   : > { %886 = vmatmul.mubr.msk.f32.gmra.mrb[12].mxu0 %vm351_vm0, %v349_v63  ;;  %v893_v63 = vld [vmem:[%s1195_s9 + $0x68] sm:$0xff] }
  0x5c   : > { %482 = vmatprep.mubr.f32.mxu0 %v1025_v32 }
  0x5f   : > { %887 = vmatmul.mubr.msk.f32.gmra.mrb[14].mxu0 %vm351_vm0, %v350_v0  ;;  %v894_v0 = vld [vmem:[%s1195_s9 + $0x70] sm:$0xff] }
 0x116   : > { %v442_v1 = vpop.f32.mrb[0].mxu0 }
 0x117   : > { %v444_v2 = vpop.f32.mrb[1].mxu0  ;;  %v489_v4 = vmax.f32 %v442_v1, 0.0  ;;  %v895_v1 = vld [vmem:[%s1195_s9 + $0x78] sm:$0xff] }
 0x118   : > { %v490_v7 = vmax.f32 %v444_v2, 0.0 }
 0x11a   : > { %v448_v3 = vpop.f32.mrb[2].mxu0 }
 0x11b   : > { %v491_v5 = vmax.f32 %v448_v3, 0.0  ;;  %v450_v6 = vpop.f32.mrb[3].mxu0 }
 0x11c   : > { %v492_v8 = vmax.f32 %v450_v6, 0.0 }
 0x11d   : > { %v930_v9 = vpack.c.bf16 %v491_v5, %v489_v4 }
 0x11e   : > { %v454_v10 = vpop.f32.mrb[4].mxu0  ;;  %v928_v11 = vpack.c.bf16 %v492_v8, %v490_v7 }
 0x11f   : > { %v456_v12 = vpop.f32.mrb[5].mxu0  ;;  %v493_v14 = vmax.f32 %v454_v10, 0.0 }
 0x120   : > { %929 = vmatprep.subr.bf16.mxu1 %v928_v11  ;;  %v494_v17 = vmax.f32 %v456_v12, 0.0 }
 0x121   : > { %931 = vmatpush1.bf16.msra.mxu1 %v930_v9 }
 0x122   : > { %v460_v13 = vpop.f32.mrb[6].mxu0 }
 0x123   : > { %v495_v15 = vmax.f32 %v460_v13, 0.0  ;;  %v462_v16 = vpop.f32.mrb[7].mxu0 }
 0x124   : > { %v496_v18 = vmax.f32 %v462_v16, 0.0 }
 0x125   : > { %v934_v19 = vpack.c.bf16 %v495_v15, %v493_v14 }
 0x126   : > { %v932_v20 = vpack.c.bf16 %v496_v18, %v494_v17  ;;  %v466_v21 = vpop.f32.mrb[8].mxu0 }
 0x127   : > { %v468_v22 = vpop.f32.mrb[9].mxu0  ;;  %v497_v24 = vmax.f32 %v466_v21, 0.0 }
 0x128   : > { %933 = vmatprep.subr.bf16.mxu1 %v932_v20  ;;  %v498_v27 = vmax.f32 %v468_v22, 0.0 }
 0x129   : > { %935 = vmatpush1.bf16.msra.mxu1 %v934_v19 }
 0x12a   : > { %v472_v23 = vpop.f32.mrb[10].mxu0 }
 0x12b   : > { %v499_v25 = vmax.f32 %v472_v23, 0.0  ;;  %v474_v26 = vpop.f32.mrb[11].mxu0 }
 0x12c   : > { %v500_v28 = vmax.f32 %v474_v26, 0.0 }
 0x12d   : > { %v938_v29 = vpack.c.bf16 %v499_v25, %v497_v24 }
 0x12e   : > { %v936_v30 = vpack.c.bf16 %v500_v28, %v498_v27  ;;  %v478_v31 = vpop.f32.mrb[12].mxu0 }
 0x12f   : > { %v480_v36 = vpop.f32.mrb[13].mxu0  ;;  %v501_v41 = vmax.f32 %v478_v31, 0.0 }
 0x130   : > { %937 = vmatprep.subr.bf16.mxu1 %v936_v30  ;;  %v502_v52 = vmax.f32 %v480_v36, 0.0 }
 0x131   : > { %939 = vmatpush1.bf16.msra.mxu1 %v938_v29 }
 0x132   : > { %v484_v40 = vpop.f32.mrb[14].mxu0 }
 0x133   : > { %v503_v46 = vmax.f32 %v484_v40, 0.0  ;;  %v486_v47 = vpop.f32.mrb[15].mxu0 }
 0x134   : > { %v504_v53 = vmax.f32 %v486_v47, 0.0 }
 0x135   : > { %v942_v56 = vpack.c.bf16 %v503_v46, %v501_v41 }
 0x136   : > { %v940_v57 = vpack.c.bf16 %v504_v53, %v502_v52 }
 0x138   : > { %941 = vmatprep.subr.bf16.mxu1 %v940_v57 }
 0x139   : > { %943 = vmatpush1.bf16.msra.mxu1 %v942_v56 }
 0x13c   : > { %896 = vmatmul.mubr.msk.f32.vlgmr.msra.gmra.mrb[0].mxu1 %vm351_vm0, %v888_v58 }
 0x13d   : > { %608 = vmatprep.mubr.f32.mxu1 %v1025_v32 }
 0x140   : > { %897 = vmatmul.mubr.msk.f32.gmra.mrb[2].mxu1 %vm351_vm0, %v889_v59 }
 0x141   : > { %614 = vmatprep.mubr.f32.mxu1 %v1025_v32 }
 0x144   : > { %898 = vmatmul.mubr.msk.f32.gmra.mrb[4].mxu1 %vm351_vm0, %v890_v60 }
 0x145   : > { %620 = vmatprep.mubr.f32.mxu1 %v1025_v32 }
 0x148   : > { %899 = vmatmul.mubr.msk.f32.gmra.mrb[6].mxu1 %vm351_vm0, %v891_v61 }
 0x149   : > { %626 = vmatprep.mubr.f32.mxu1 %v1025_v32 }
 0x14c   : > { %900 = vmatmul.mubr.msk.f32.gmra.mrb[8].mxu1 %vm351_vm0, %v892_v62 }
 0x14d   : > { %632 = vmatprep.mubr.f32.mxu1 %v1025_v32 }
 0x150   : > { %901 = vmatmul.mubr.msk.f32.gmra.mrb[10].mxu1 %vm351_vm0, %v893_v63 }
 0x151   : > { %638 = vmatprep.mubr.f32.mxu1 %v1025_v32 }
 0x154   : > { %902 = vmatmul.mubr.msk.f32.gmra.mrb[12].mxu1 %vm351_vm0, %v894_v0 }
 0x155   : > { %644 = vmatprep.mubr.f32.mxu1 %v1025_v32 }
 0x158   : > { %903 = vmatmul.mubr.msk.f32.gmra.mrb[14].mxu1 %vm351_vm0, %v895_v1 }
 0x20f   : > { %v604_v2 = vpop.f32.mrb[0].mxu1 }
 0x210   : > { %v651_v3 = vmax.f32 %v604_v2, 0.0  ;;  %v606_v4 = vpop.f32.mrb[1].mxu1 }
 0x211   : > { %v652_v5 = vmax.f32 %v606_v4, 0.0 }
 0x212   : > { %v667_v6 = vadd.f32 %v651_v3, %v1150_v35 }
 0x213   : > { %v668_v7 = vadd.f32 %v652_v5, %v1146_v33  ;;  %v610_v8 = vpop.f32.mrb[2].mxu1 }
 0x214   : > { %v683_v9 = vmax.f32 %v667_v6, 0.0  ;;  %v653_v10 = vmax.f32 %v610_v8, 0.0  ;;  %v612_v11 = vpop.f32.mrb[3].mxu1 }
 0x215   : > { %v684_v12 = vmax.f32 %v668_v7, 0.0  ;;  %v654_v13 = vmax.f32 %v612_v11, 0.0 }
 0x216   : > { %701 = vst [vmem:[%s1246_s16] sm:$0xff] %v683_v9  ;;  %v669_v32 = vadd.f32 %v653_v10, %v1154_v37 }
 0x217   : > { %702 = vst [vmem:[%s1246_s16 + $0x8] sm:$0xff] %v684_v12  ;;  %v670_v35 = vadd.f32 %v654_v13, %v1148_v34  ;;  %v616_v14 = vpop.f32.mrb[4].mxu1 }
 0x218   : > { %v685_v33 = vmax.f32 %v669_v32, 0.0  ;;  %v655_v15 = vmax.f32 %v616_v14, 0.0  ;;  %v618_v16 = vpop.f32.mrb[5].mxu1 }
 0x219   : > { %v686_v17 = vmax.f32 %v670_v35, 0.0  ;;  %v656_v18 = vmax.f32 %v618_v16, 0.0 }
 0x21a   : > { %703 = vst [vmem:[%s1246_s16 + $0x10] sm:$0xff] %v685_v33  ;;  %v671_v19 = vadd.f32 %v655_v15, %v1164_v42 }
 0x21b   : > { %704 = vst [vmem:[%s1246_s16 + $0x18] sm:$0xff] %v686_v17  ;;  %v672_v20 = vadd.f32 %v656_v18, %v1156_v38  ;;  %v622_v21 = vpop.f32.mrb[6].mxu1 }
 0x21c   : > { %v687_v37 = vmax.f32 %v671_v19, 0.0  ;;  %v657_v22 = vmax.f32 %v622_v21, 0.0  ;;  %v624_v34 = vpop.f32.mrb[7].mxu1 }
 0x21d   : > { %v688_v23 = vmax.f32 %v672_v20, 0.0  ;;  %v658_v24 = vmax.f32 %v624_v34, 0.0 }
 0x21e   : > { %705 = vst [vmem:[%s1246_s16 + $0x20] sm:$0xff] %v687_v37  ;;  %v673_v25 = vadd.f32 %v657_v22, %v1166_v43 }
 0x21f   : > { %706 = vst [vmem:[%s1246_s16 + $0x28] sm:$0xff] %v688_v23  ;;  %v674_v26 = vadd.f32 %v658_v24, %v1158_v39  ;;  %v628_v27 = vpop.f32.mrb[8].mxu1 }
 0x220   : > { %v689_v42 = vmax.f32 %v673_v25, 0.0  ;;  %v659_v28 = vmax.f32 %v628_v27, 0.0  ;;  %v630_v38 = vpop.f32.mrb[9].mxu1 }
 0x221   : > { %v690_v29 = vmax.f32 %v674_v26, 0.0  ;;  %v660_v30 = vmax.f32 %v630_v38, 0.0 }
 0x222   : > { %707 = vst [vmem:[%s1246_s16 + $0x30] sm:$0xff] %v689_v42  ;;  %v675_v31 = vadd.f32 %v659_v28, %v1176_v48 }
 0x223   : > { %708 = vst [vmem:[%s1246_s16 + $0x38] sm:$0xff] %v690_v29  ;;  %v676_v36 = vadd.f32 %v660_v30, %v1168_v44  ;;  %v634_v40 = vpop.f32.mrb[10].mxu1 }
 0x224   : > { %v691_v43 = vmax.f32 %v675_v31, 0.0  ;;  %v661_v41 = vmax.f32 %v634_v40, 0.0  ;;  %v636_v39 = vpop.f32.mrb[11].mxu1 }
 0x225   : > { %v692_v46 = vmax.f32 %v676_v36, 0.0  ;;  %v662_v47 = vmax.f32 %v636_v39, 0.0  ;;  %v750_v6 = vld [vmem:[%s1246_s16 + $0x20] sm:$0xff] (%p1080_p6) }
 0x226   : > { %709 = vst [vmem:[%s1246_s16 + $0x40] sm:$0xff] %v691_v43  ;;  %v677_v52 = vadd.f32 %v661_v41, %v1178_v49  ;;  %v752_v7 = vld [vmem:[%s1246_s16 + $0x28] sm:$0xff] (%p1080_p6)  ;;  %751 = vst [vmem:[%s729_s22 + $0x20] sm:$0xff] (%p1080_p6), %v750_v6 }
 0x227   : > { %710 = vst [vmem:[%s1246_s16 + $0x48] sm:$0xff] %v692_v46  ;;  %v678_v53 = vadd.f32 %v662_v47, %v1170_v45  ;;  %v640_v56 = vpop.f32.mrb[12].mxu1  ;;  %753 = vst [vmem:[%s729_s22 + $0x28] sm:$0xff] (%p1080_p6), %v752_v7 }
 0x228   : > { %v693_v48 = vmax.f32 %v677_v52, 0.0  ;;  %v663_v57 = vmax.f32 %v640_v56, 0.0  ;;  %v642_v44 = vpop.f32.mrb[13].mxu1 }
 0x229   : > { %v694_v58 = vmax.f32 %v678_v53, 0.0  ;;  %v664_v59 = vmax.f32 %v642_v44, 0.0  ;;  %v754_v8 = vld [vmem:[%s1246_s16 + $0x30] sm:$0xff] (%p1080_p6) }
 0x22a   : > { %711 = vst [vmem:[%s1246_s16 + $0x50] sm:$0xff] %v693_v48  ;;  %v679_v60 = vadd.f32 %v663_v57, %v1188_v54  ;;  %v746_v54 = vld [vmem:[%s1246_s16 + $0x10] sm:$0xff] (%p1080_p6)  ;;  %v756_v9 = vld [vmem:[%s1246_s16 + $0x38] sm:$0xff] (%p1080_p6)  ;;  %755 = vst [vmem:[%s729_s22 + $0x30] sm:$0xff] (%p1080_p6), %v754_v8 }
 0x22b   : > { %712 = vst [vmem:[%s1246_s16 + $0x58] sm:$0xff] %v694_v58  ;;  %v680_v61 = vadd.f32 %v664_v59, %v1180_v50  ;;  %v646_v49 = vpop.f32.mrb[14].mxu1  ;;  %v742_v50 = vld [vmem:[%s1246_s16] sm:$0xff] (%p1080_p6)  ;;  %747 = vst [vmem:[%s729_s22 + $0x10] sm:$0xff] (%p1080_p6), %v746_v54 }
 0x22c   : > { %v695_v62 = vmax.f32 %v679_v60, 0.0  ;;  %v665_v63 = vmax.f32 %v646_v49, 0.0  ;;  %v648_v45 = vpop.f32.mrb[15].mxu1  ;;  %743 = vst [vmem:[%s729_s22] sm:$0xff] (%p1080_p6), %v742_v50  ;;  %757 = vst [vmem:[%s729_s22 + $0x38] sm:$0xff] (%p1080_p6), %v756_v9 }
 0x22d   : > { %v696_v0 = vmax.f32 %v680_v61, 0.0  ;;  %v666_v1 = vmax.f32 %v648_v45, 0.0  ;;  %723 = sbr.rel (!%p1080_p6) target bundleno = 572 (0x23c), region = 93  ;;  %v758_v10 = vld [vmem:[%s1246_s16 + $0x40] sm:$0xff] (%p1080_p6) }
 0x22e   : > { %713 = vst [vmem:[%s1246_s16 + $0x60] sm:$0xff] %v695_v62  ;;  %v681_v2 = vadd.f32 %v665_v63, %v1190_v55  ;;  %v748_v55 = vld [vmem:[%s1246_s16 + $0x18] sm:$0xff] (%p1080_p6)  ;;  %759 = vst [vmem:[%s729_s22 + $0x80] sm:$0xff] (%p1080_p6), %v758_v10  ;;  %v760_v11 = vld [vmem:[%s1246_s16 + $0x48] sm:$0xff] (%p1080_p6) }
 0x22f   : > { %714 = vst [vmem:[%s1246_s16 + $0x68] sm:$0xff] %v696_v0  ;;  %v682_v3 = vadd.f32 %v666_v1, %v1182_v51  ;;  %v744_v51 = vld [vmem:[%s1246_s16 + $0x8] sm:$0xff] (%p1080_p6)  ;;  %749 = vst [vmem:[%s729_s22 + $0x18] sm:$0xff] (%p1080_p6), %v748_v55 }
 0x230   : > { %v697_v4 = vmax.f32 %v681_v2, 0.0  ;;  %745 = vst [vmem:[%s729_s22 + $0x8] sm:$0xff] (%p1080_p6), %v744_v51  ;;  %761 = vst [vmem:[%s729_s22 + $0x88] sm:$0xff] (%p1080_p6), %v760_v11 }
 0x231   : > { %v698_v5 = vmax.f32 %v682_v3, 0.0  ;;  %v762_v12 = vld [vmem:[%s1246_s16 + $0x50] sm:$0xff] (%p1080_p6) }
 0x232   : > { %715 = vst [vmem:[%s1246_s16 + $0x70] sm:$0xff] %v697_v4  ;;  %v764_v13 = vld [vmem:[%s1246_s16 + $0x58] sm:$0xff] (%p1080_p6)  ;;  %763 = vst [vmem:[%s729_s22 + $0x90] sm:$0xff] (%p1080_p6), %v762_v12 }
 0x233   : > { %716 = vst [vmem:[%s1246_s16 + $0x78] sm:$0xff] %v698_v5  ;;  %765 = vst [vmem:[%s729_s22 + $0x98] sm:$0xff] (%p1080_p6), %v764_v13 }
 0x235   : > { %v766_v32 = vld [vmem:[%s1246_s16 + $0x60] sm:$0xff] }
 0x236   : > { %v768_v35 = vld [vmem:[%s1246_s16 + $0x68] sm:$0xff]  ;;  %767 = vst [vmem:[%s729_s22 + $0xa0] sm:$0xff] %v766_v32 }
 0x237   : > { %769 = vst [vmem:[%s729_s22 + $0xa8] sm:$0xff] %v768_v35 }
 0x239   : > { %v770_v14 = vld [vmem:[%s1246_s16 + $0x70] sm:$0xff] }
 0x23a   : > { %771 = vst [vmem:[%s729_s22 + $0xb0] sm:$0xff] %v770_v14  ;;  %v772_v33 = vld [vmem:[%s1246_s16 + $0x78] sm:$0xff] }
 0x23b   : > { %773 = vst [vmem:[%s729_s22 + $0xb8] sm:$0xff] %v772_v33 }
 0x23c PF: > { %s12_s13 = sadd.s32 1, %s1023_s13   ;;  %s1320_s9 = smov %s1011_s10 }
 0x23d   : > { %p9_p11 = scmp.ge.s32.totalorder %s12_s13, 4   ;;  %s1321_s10 = smov %s1085_s20 }
 0x23e   : > { %s1322_s11 = smov %s1019_s12  ;;  %s1323_s12 = smov %s1325_s14 }
 0x23f   :  { %11 = sbr.rel (!%p9_p11) target bundleno = 3 (0x3), region = 158 }

</bundles_post_ra>
